<compile_context>
chip_gen: v5e
topology: v5e:2x2
jax: 0.10.0
libtpu: 0.0.40
codegen_flags: <defaults>
</compile_context>

<pallas_src>
import functools
import math

import jax
import jax.numpy as jnp
from jax import lax
from jax.experimental import pallas as pl
from jax.experimental.pallas import tpu as pltpu


def rnn_fc_chunk_kernel(x_ref, wih_ref, whh_ref, b_ref, wfc_ref, bfc_ref,
                        out_ref, hs_ref, h_carry_ref,
                        *, steps_per_chunk, steps_per_block, batch, unroll):
    """Processes one time-chunk of the sequence per grid step.

    x_ref   : (steps_per_chunk*batch, I)   chunk of inputs      (mxu dtype)
    wih_ref : (I, H)     W_ih^T                                  (mxu dtype)
    whh_ref : (H, H)     W_hh^T                                  (f32)
    b_ref   : (1, H)     b_ih + b_hh (folded)                    (f32)
    wfc_ref : (H, 128k)  lane-padded W_fc^T                      (mxu dtype)
    bfc_ref : (1, 128k)  lane-padded b_fc                        (f32)
    out_ref : (steps_per_chunk*batch, 128k) lane-dense FC output
    hs_ref  : VMEM (steps_per_chunk*batch, H) f32 scratch — holds the hoisted
              input projection, overwritten in place by the hidden states.
    h_carry_ref : VMEM (batch, H) f32 — hidden state carried across chunks.
    """
    rows_per_block = steps_per_block * batch

    # h_0 = 0 (init_state()): initialize the carry on the first chunk only.
    @pl.when(pl.program_id(0) == 0)
    def _():
        h_carry_ref[...] = jnp.zeros_like(h_carry_ref)

    # (1) Hoisted input projection for the whole chunk: one MXU matmul, written
    #     straight into the hidden-state slab (no separate `pre` scratch).
    hs_ref[...] = (
        jnp.dot(x_ref[...], wih_ref[...], preferred_element_type=jnp.float32)
        + b_ref[...])

    whh = whh_ref[...]

    # (2) Sequential recurrence.  Only h @ W_hh^T + tanh sits on the critical
    #     path.  Hidden states are written back in tile-aligned blocks of
    #     `rows_per_block` rows (multiple of 8 sublanes) — no 1-row masked
    #     stores competing for the scarce vst slot.
    def block_step(i, h):
        r0 = pl.multiple_of(i * rows_per_block, 8)
        pre_blk = hs_ref[pl.ds(r0, rows_per_block), :]      # one aligned load
        hs = []
        for j in range(steps_per_block):                    # static unroll
            pre_t = pre_blk[j * batch:(j + 1) * batch, :]
            h = jnp.tanh(pre_t +
                         jnp.dot(h, whh, preferred_element_type=jnp.float32))
            hs.append(h)
        hs_ref[pl.ds(r0, rows_per_block), :] = jnp.concatenate(hs, axis=0)
        return h

    n_blocks = steps_per_chunk // steps_per_block
    h_last = lax.fori_loop(0, n_blocks, block_step, h_carry_ref[...],
                           unroll=unroll)
    h_carry_ref[...] = h_last

    # (3) Deferred FC over the whole chunk: one batched matmul, one lane-dense
    #     (..,128k) unmasked store.  (Dropout is identity in eval mode.)
    out_ref[...] = (
        jnp.dot(hs_ref[...].astype(wfc_ref.dtype), wfc_ref[...],
                preferred_element_type=jnp.float32)
        + bfc_ref[...]).astype(out_ref.dtype)


@functools.partial(jax.jit, static_argnames=("mxu_dtype",))
def vanilla_rnn_forward(x, w_ih, w_hh, b_ih, b_hh, w_fc, b_fc,
                        *, mxu_dtype=jnp.bfloat16):
    """x: (S, B, I) (PyTorch nn.RNN default layout, batch_first=False).
       PyTorch weight convention: w_ih (H,I), w_hh (H,H), b_ih (H,), b_hh (H,),
       w_fc (O,H), b_fc (O,).  Returns (S, B, O) float32."""
    S, B, I = x.shape
    H = w_hh.shape[0]
    O = w_fc.shape[0]
    LANES = 128
    f32 = jnp.float32

    # --- chunking: row-blocks are multiples of 8 sublanes, ~256 rows/chunk ---
    base = 8 // math.gcd(B, 8)           # smallest #steps with base*B % 8 == 0
    target_rows = 256
    steps_per_chunk = base * max(1, target_rows // (base * B))
    steps_per_chunk = min(steps_per_chunk, base * pl.cdiv(S, base))
    n_chunks = pl.cdiv(S, steps_per_chunk)
    S_pad = n_chunks * steps_per_chunk
    rows_per_chunk = steps_per_chunk * B
    n_blocks = steps_per_chunk // base
    unroll = True if n_blocks <= 8 else 4   # modest unroll for long chunks

    # --- pre-transpose / pre-fold / cast so the kernel does plain matmuls ---
    x2d = jnp.asarray(x, f32).reshape(S * B, I)
    if S_pad != S:
        x2d = jnp.concatenate(
            [x2d, jnp.zeros(((S_pad - S) * B, I), f32)], axis=0)
    x2d = x2d.astype(mxu_dtype)

    wih_t = jnp.asarray(w_ih, f32).T.astype(mxu_dtype)          # (I, H)
    whh_t = jnp.asarray(w_hh, f32).T                            # (H, H) f32
    b = (jnp.asarray(b_ih, f32) + jnp.asarray(b_hh, f32)).reshape(1, H)

    # Lane-dense FC: zero-pad the output dimension up to a multiple of 128.
    O_pad = max(LANES, pl.cdiv(O, LANES) * LANES)
    wfc_t = jnp.zeros((H, O_pad), f32).at[:, :O].set(jnp.asarray(w_fc, f32).T)
    wfc_t = wfc_t.astype(mxu_dtype)
    bfc = jnp.zeros((1, O_pad), f32).at[:, :O].set(
        jnp.asarray(b_fc, f32).reshape(1, O))

    kernel = functools.partial(
        rnn_fc_chunk_kernel,
        steps_per_chunk=steps_per_chunk, steps_per_block=base,
        batch=B, unroll=unroll)

    grid_spec = pltpu.PrefetchScalarGridSpec(
        num_scalar_prefetch=0,
        grid=(n_chunks,),
        in_specs=[
            pl.BlockSpec((rows_per_chunk, I), lambda c: (c, 0)),   # x chunk
            pl.BlockSpec((I, H), lambda c: (0, 0)),                # W_ih^T
            pl.BlockSpec((H, H), lambda c: (0, 0)),                # W_hh^T
            pl.BlockSpec((1, H), lambda c: (0, 0)),                # folded bias
            pl.BlockSpec((H, O_pad), lambda c: (0, 0)),            # W_fc^T pad
            pl.BlockSpec((1, O_pad), lambda c: (0, 0)),            # b_fc pad
        ],
        out_specs=pl.BlockSpec((rows_per_chunk, O_pad), lambda c: (c, 0)),
        scratch_shapes=[
            pltpu.VMEM((rows_per_chunk, H), jnp.float32),   # pre -> h slab
            pltpu.VMEM((B, H), jnp.float32),                # hidden carry
        ])

    out_padded = pl.pallas_call(
        kernel,
        out_shape=jax.ShapeDtypeStruct((S_pad * B, O_pad), jnp.float32),
        grid_spec=grid_spec,
        compiler_params=pltpu.CompilerParams(
            dimension_semantics=("arbitrary",)),   # sequential h carry
    )(x2d, wih_t, whh_t, b, wfc_t, bfc)

    return out_padded[:S * B, :O].reshape(S, B, O)


def _reference(x, w_ih, w_hh, b_ih, b_hh, w_fc, b_fc):
    """Pure-JAX reference mirroring torch.nn.RNN + Linear (eval mode)."""
    _, B, _ = x.shape
    H = w_hh.shape[0]

    def step(h, x_t):
        h_new = jnp.tanh(x_t @ w_ih.T + b_ih + h @ w_hh.T + b_hh)
        return h_new, h_new

    h0 = jnp.zeros((B, H), jnp.float32)
    _, hs = jax.lax.scan(step, h0, x)        # (S, B, H)
    return hs @ w_fc.T + b_fc                # (S, B, O)


if __name__ == "__main__":
    # Small shapes consistent with the module: state is (1, 1, hidden) → batch=1.
    SEQ, BATCH, INPUT, HIDDEN, OUTPUT = 8, 1, 16, 32, 8

    key = jax.random.PRNGKey(0)
    ks = jax.random.split(key, 8)
    bound_rnn = 1.0 / math.sqrt(HIDDEN)
    bound_fc = 1.0 / math.sqrt(HIDDEN)

    x = jax.random.normal(ks[0], (SEQ, BATCH, INPUT), jnp.float32)
    w_ih = jax.random.uniform(ks[1], (HIDDEN, INPUT), jnp.float32, -bound_rnn, bound_rnn)
    w_hh = jax.random.uniform(ks[2], (HIDDEN, HIDDEN), jnp.float32, -bound_rnn, bound_rnn)
    b_ih = jax.random.uniform(ks[3], (HIDDEN,), jnp.float32, -bound_rnn, bound_rnn)
    b_hh = jax.random.uniform(ks[4], (HIDDEN,), jnp.float32, -bound_rnn, bound_rnn)
    w_fc = jax.random.uniform(ks[5], (OUTPUT, HIDDEN), jnp.float32, -bound_fc, bound_fc)
    b_fc = jax.random.uniform(ks[6], (OUTPUT,), jnp.float32, -bound_fc, bound_fc)

    ref = _reference(x, w_ih, w_hh, b_ih, b_hh, w_fc, b_fc)

    # f32 MXU variant: tight semantic check of the kernel structure.
    out_f32 = vanilla_rnn_forward(x, w_ih, w_hh, b_ih, b_hh, w_fc, b_fc,
                                  mxu_dtype=jnp.float32)
    out_f32 = jax.block_until_ready(out_f32)
    assert out_f32.shape == (SEQ, BATCH, OUTPUT)
    assert jnp.allclose(out_f32, ref, atol=1e-5, rtol=1e-5)

    # bf16 MXU variant (default / performance configuration): loose tolerance —
    # the f32 variant above is the tight correctness check.
    out_bf16 = vanilla_rnn_forward(x, w_ih, w_hh, b_ih, b_hh, w_fc, b_fc,
                                   mxu_dtype=jnp.bfloat16)
    out_bf16 = jax.block_until_ready(out_bf16)
    assert out_bf16.shape == (SEQ, BATCH, OUTPUT)
    assert jnp.allclose(out_bf16, ref, atol=1e-1, rtol=1e-1)

    print("KERNEL_OK")
</pallas_src>

<mosaic_0001>
module attributes {stable_mosaic.version = 11 : i64} {
  func.func @rnn_fc_chunk_kernel(%arg0: i32, %arg1: memref<8x16xf32, #tpu.memory_space<vmem>>, %arg2: memref<16x32xf32, #tpu.memory_space<vmem>>, %arg3: memref<32x32xf32, #tpu.memory_space<vmem>>, %arg4: memref<1x32xf32, #tpu.memory_space<vmem>>, %arg5: memref<32x128xf32, #tpu.memory_space<vmem>>, %arg6: memref<1x128xf32, #tpu.memory_space<vmem>>, %arg7: memref<8x128xf32, #tpu.memory_space<vmem>>, %arg8: memref<8x32xf32, #tpu.memory_space<vmem>>, %arg9: memref<1x32xf32, #tpu.memory_space<vmem>>) attributes {dimension_semantics = [#tpu.dimension_semantics<arbitrary>], iteration_bounds = array<i64: 1>, scalar_prefetch = 0 : i64, scratch_operands = 2 : i64, tpu.core_type = #tpu.core_type<tc>, window_params = [{transform_indices = @transform_0, window_bounds = array<i64: 8, 16>}, {pipeline_mode = #tpu.pipeline_mode<synchronous>, transform_indices = @transform_1, window_bounds = array<i64: 16, 32>}, {pipeline_mode = #tpu.pipeline_mode<synchronous>, transform_indices = @transform_2, window_bounds = array<i64: 32, 32>}, {pipeline_mode = #tpu.pipeline_mode<synchronous>, transform_indices = @transform_3, window_bounds = array<i64: 1, 32>}, {pipeline_mode = #tpu.pipeline_mode<synchronous>, transform_indices = @transform_4, window_bounds = array<i64: 32, 128>}, {pipeline_mode = #tpu.pipeline_mode<synchronous>, transform_indices = @transform_5, window_bounds = array<i64: 1, 128>}, {transform_indices = @transform_6, window_bounds = array<i64: 8, 128>}]} {
    %c0_i32 = arith.constant 0 : i32
    %0 = arith.cmpi eq, %arg0, %c0_i32 : i32
    %1 = arith.extui %0 : i1 to i32
    %c0_i32_0 = arith.constant 0 : i32
    %2 = arith.cmpi ne, %1, %c0_i32_0 : i32
    scf.if %2 {
      %cst_34 = arith.constant 0.000000e+00 : f32
      %59 = vector.broadcast %cst_34 : f32 to vector<1x32xf32>
      %c0_35 = arith.constant 0 : index
      %c0_36 = arith.constant 0 : index
      %60 = vector.load %arg9[%c0_35, %c0_36] : memref<1x32xf32, #tpu.memory_space<vmem>>, vector<1x32xf32>
      tpu.vector_store %arg9[%c0_35, %c0_36], %59 {strides = array<i32>} : memref<1x32xf32, #tpu.memory_space<vmem>>, vector<1x32xf32>,
    } else {
    }
    %c0 = arith.constant 0 : index
    %c0_1 = arith.constant 0 : index
    %3 = vector.load %arg1[%c0, %c0_1] : memref<8x16xf32, #tpu.memory_space<vmem>>, vector<8x16xf32>
    %c0_2 = arith.constant 0 : index
    %c0_3 = arith.constant 0 : index
    %4 = vector.load %arg2[%c0_2, %c0_3] : memref<16x32xf32, #tpu.memory_space<vmem>>, vector<16x32xf32>
    %cst = arith.constant dense<0.000000e+00> : vector<8x32xf32>
    %5 = tpu.matmul %3, %4, %cst {dimension_numbers = #tpu.dot_dimension_numbers<[1], [0], [0], [1], [0, 0, 1, 1], [], []>} : vector<8x16xf32>, vector<16x32xf32>, vector<8x32xf32> -> vector<8x32xf32>
    %c0_4 = arith.constant 0 : index
    %c0_5 = arith.constant 0 : index
    %6 = vector.load %arg4[%c0_4, %c0_5] : memref<1x32xf32, #tpu.memory_space<vmem>>, vector<1x32xf32>
    %7 = vector.broadcast %6 : vector<1x32xf32> to vector<8x32xf32>
    %8 = arith.addf %5, %7 : vector<8x32xf32>
    %c0_6 = arith.constant 0 : index
    %c0_7 = arith.constant 0 : index
    %9 = vector.load %arg8[%c0_6, %c0_7] : memref<8x32xf32, #tpu.memory_space<vmem>>, vector<8x32xf32>
    tpu.vector_store %arg8[%c0_6, %c0_7], %8 {strides = array<i32>} : memref<8x32xf32, #tpu.memory_space<vmem>>, vector<8x32xf32>,
    %c0_8 = arith.constant 0 : index
    %c0_9 = arith.constant 0 : index
    %10 = vector.load %arg3[%c0_8, %c0_9] : memref<32x32xf32, #tpu.memory_space<vmem>>, vector<32x32xf32>
    %c0_10 = arith.constant 0 : index
    %c0_11 = arith.constant 0 : index
    %11 = vector.load %arg9[%c0_10, %c0_11] : memref<1x32xf32, #tpu.memory_space<vmem>>, vector<1x32xf32>
    %c0_i32_12 = arith.constant 0 : i32
    %c8_i32 = arith.constant 8 : i32
    %12 = arith.muli %c0_i32_12, %c8_i32 : i32
    %13 = tpu.assume_multiple %12, 8 : i32
    %14 = arith.index_cast %13 : i32 to index
    %c0_13 = arith.constant 0 : index
    %15 = vector.load %arg8[%14, %c0_13] : memref<8x32xf32, #tpu.memory_space<vmem>>, vector<8x32xf32>
    %16 = vector.extract_strided_slice %15 {offsets = [0, 0], sizes = [1, 32], strides = [1, 1]} : vector<8x32xf32> to vector<1x32xf32>
    %cst_14 = arith.constant dense<0.000000e+00> : vector<1x32xf32>
    %17 = tpu.matmul %11, %10, %cst_14 {dimension_numbers = #tpu.dot_dimension_numbers<[1], [0], [0], [1], [0, 0, 1, 1], [], []>} : vector<1x32xf32>, vector<32x32xf32>, vector<1x32xf32> -> vector<1x32xf32>
    %18 = arith.addf %16, %17 : vector<1x32xf32>
    %19 = math.tanh %18 : vector<1x32xf32>
    %20 = vector.extract_strided_slice %15 {offsets = [1, 0], sizes = [1, 32], strides = [1, 1]} : vector<8x32xf32> to vector<1x32xf32>
    %cst_15 = arith.constant dense<0.000000e+00> : vector<1x32xf32>
    %21 = tpu.matmul %19, %10, %cst_15 {dimension_numbers = #tpu.dot_dimension_numbers<[1], [0], [0], [1], [0, 0, 1, 1], [], []>} : vector<1x32xf32>, vector<32x32xf32>, vector<1x32xf32> -> vector<1x32xf32>
    %22 = arith.addf %20, %21 : vector<1x32xf32>
    %23 = math.tanh %22 : vector<1x32xf32>
    %24 = vector.extract_strided_slice %15 {offsets = [2, 0], sizes = [1, 32], strides = [1, 1]} : vector<8x32xf32> to vector<1x32xf32>
    %cst_16 = arith.constant dense<0.000000e+00> : vector<1x32xf32>
    %25 = tpu.matmul %23, %10, %cst_16 {dimension_numbers = #tpu.dot_dimension_numbers<[1], [0], [0], [1], [0, 0, 1, 1], [], []>} : vector<1x32xf32>, vector<32x32xf32>, vector<1x32xf32> -> vector<1x32xf32>
    %26 = arith.addf %24, %25 : vector<1x32xf32>
    %27 = math.tanh %26 : vector<1x32xf32>
    %28 = vector.extract_strided_slice %15 {offsets = [3, 0], sizes = [1, 32], strides = [1, 1]} : vector<8x32xf32> to vector<1x32xf32>
    %cst_17 = arith.constant dense<0.000000e+00> : vector<1x32xf32>
    %29 = tpu.matmul %27, %10, %cst_17 {dimension_numbers = #tpu.dot_dimension_numbers<[1], [0], [0], [1], [0, 0, 1, 1], [], []>} : vector<1x32xf32>, vector<32x32xf32>, vector<1x32xf32> -> vector<1x32xf32>
    %30 = arith.addf %28, %29 : vector<1x32xf32>
    %31 = math.tanh %30 : vector<1x32xf32>
    %32 = vector.extract_strided_slice %15 {offsets = [4, 0], sizes = [1, 32], strides = [1, 1]} : vector<8x32xf32> to vector<1x32xf32>
    %cst_18 = arith.constant dense<0.000000e+00> : vector<1x32xf32>
    %33 = tpu.matmul %31, %10, %cst_18 {dimension_numbers = #tpu.dot_dimension_numbers<[1], [0], [0], [1], [0, 0, 1, 1], [], []>} : vector<1x32xf32>, vector<32x32xf32>, vector<1x32xf32> -> vector<1x32xf32>
    %34 = arith.addf %32, %33 : vector<1x32xf32>
    %35 = math.tanh %34 : vector<1x32xf32>
    %36 = vector.extract_strided_slice %15 {offsets = [5, 0], sizes = [1, 32], strides = [1, 1]} : vector<8x32xf32> to vector<1x32xf32>
    %cst_19 = arith.constant dense<0.000000e+00> : vector<1x32xf32>
    %37 = tpu.matmul %35, %10, %cst_19 {dimension_numbers = #tpu.dot_dimension_numbers<[1], [0], [0], [1], [0, 0, 1, 1], [], []>} : vector<1x32xf32>, vector<32x32xf32>, vector<1x32xf32> -> vector<1x32xf32>
    %38 = arith.addf %36, %37 : vector<1x32xf32>
    %39 = math.tanh %38 : vector<1x32xf32>
    %40 = vector.extract_strided_slice %15 {offsets = [6, 0], sizes = [1, 32], strides = [1, 1]} : vector<8x32xf32> to vector<1x32xf32>
    %cst_20 = arith.constant dense<0.000000e+00> : vector<1x32xf32>
    %41 = tpu.matmul %39, %10, %cst_20 {dimension_numbers = #tpu.dot_dimension_numbers<[1], [0], [0], [1], [0, 0, 1, 1], [], []>} : vector<1x32xf32>, vector<32x32xf32>, vector<1x32xf32> -> vector<1x32xf32>
    %42 = arith.addf %40, %41 : vector<1x32xf32>
    %43 = math.tanh %42 : vector<1x32xf32>
    %44 = vector.extract_strided_slice %15 {offsets = [7, 0], sizes = [1, 32], strides = [1, 1]} : vector<8x32xf32> to vector<1x32xf32>
    %cst_21 = arith.constant dense<0.000000e+00> : vector<1x32xf32>
    %45 = tpu.matmul %43, %10, %cst_21 {dimension_numbers = #tpu.dot_dimension_numbers<[1], [0], [0], [1], [0, 0, 1, 1], [], []>} : vector<1x32xf32>, vector<32x32xf32>, vector<1x32xf32> -> vector<1x32xf32>
    %46 = arith.addf %44, %45 : vector<1x32xf32>
    %47 = math.tanh %46 : vector<1x32xf32>
    %48 = tpu.concatenate %19, %23, %27, %31, %35, %39, %43, %47 in 0 : vector<1x32xf32>, vector<1x32xf32>, vector<1x32xf32>, vector<1x32xf32>, vector<1x32xf32>, vector<1x32xf32>, vector<1x32xf32>, vector<1x32xf32> -> vector<8x32xf32>
    %49 = arith.index_cast %13 : i32 to index
    %c0_22 = arith.constant 0 : index
    %50 = vector.load %arg8[%49, %c0_22] : memref<8x32xf32, #tpu.memory_space<vmem>>, vector<8x32xf32>
    tpu.vector_store %arg8[%49, %c0_22], %48 {strides = array<i32>} : memref<8x32xf32, #tpu.memory_space<vmem>>, vector<8x32xf32>,
    %c1_i32 = arith.constant 1 : i32
    %c0_23 = arith.constant 0 : index
    %c0_24 = arith.constant 0 : index
    %51 = vector.load %arg9[%c0_23, %c0_24] : memref<1x32xf32, #tpu.memory_space<vmem>>, vector<1x32xf32>
    tpu.vector_store %arg9[%c0_23, %c0_24], %47 {strides = array<i32>} : memref<1x32xf32, #tpu.memory_space<vmem>>, vector<1x32xf32>,
    %c0_25 = arith.constant 0 : index
    %c0_26 = arith.constant 0 : index
    %52 = vector.load %arg8[%c0_25, %c0_26] : memref<8x32xf32, #tpu.memory_space<vmem>>, vector<8x32xf32>
    %c0_27 = arith.constant 0 : index
    %c0_28 = arith.constant 0 : index
    %53 = vector.load %arg5[%c0_27, %c0_28] : memref<32x128xf32, #tpu.memory_space<vmem>>, vector<32x128xf32>
    %cst_29 = arith.constant dense<0.000000e+00> : vector<8x128xf32>
    %54 = tpu.matmul %52, %53, %cst_29 {dimension_numbers = #tpu.dot_dimension_numbers<[1], [0], [0], [1], [0, 0, 1, 1], [], []>} : vector<8x32xf32>, vector<32x128xf32>, vector<8x128xf32> -> vector<8x128xf32>
    %c0_30 = arith.constant 0 : index
    %c0_31 = arith.constant 0 : index
    %55 = vector.load %arg6[%c0_30, %c0_31] : memref<1x128xf32, #tpu.memory_space<vmem>>, vector<1x128xf32>
    %56 = vector.broadcast %55 : vector<1x128xf32> to vector<8x128xf32>
    %57 = arith.addf %54, %56 : vector<8x128xf32>
    %c0_32 = arith.constant 0 : index
    %c0_33 = arith.constant 0 : index
    %58 = vector.load %arg7[%c0_32, %c0_33] : memref<8x128xf32, #tpu.memory_space<vmem>>, vector<8x128xf32>
    tpu.vector_store %arg7[%c0_32, %c0_33], %57 {strides = array<i32>} : memref<8x128xf32, #tpu.memory_space<vmem>>, vector<8x128xf32>,
    return
  }
  func.func @transform_0(%arg0: i32) -> (i32, i32) {
    %c0_i32 = arith.constant 0 : i32
    %c0_i32_0 = arith.constant 0 : i32
    return %arg0, %c0_i32 : i32, i32
  }
  func.func @transform_1(%arg0: i32) -> (i32, i32) {
    %c0_i32 = arith.constant 0 : i32
    %c0_i32_0 = arith.constant 0 : i32
    %c0_i32_1 = arith.constant 0 : i32
    return %c0_i32, %c0_i32_0 : i32, i32
  }
  func.func @transform_2(%arg0: i32) -> (i32, i32) {
    %c0_i32 = arith.constant 0 : i32
    %c0_i32_0 = arith.constant 0 : i32
    %c0_i32_1 = arith.constant 0 : i32
    return %c0_i32, %c0_i32_0 : i32, i32
  }
  func.func @transform_3(%arg0: i32) -> (i32, i32) {
    %c0_i32 = arith.constant 0 : i32
    %c0_i32_0 = arith.constant 0 : i32
    %c0_i32_1 = arith.constant 0 : i32
    return %c0_i32, %c0_i32_0 : i32, i32
  }
  func.func @transform_4(%arg0: i32) -> (i32, i32) {
    %c0_i32 = arith.constant 0 : i32
    %c0_i32_0 = arith.constant 0 : i32
    %c0_i32_1 = arith.constant 0 : i32
    return %c0_i32, %c0_i32_0 : i32, i32
  }
  func.func @transform_5(%arg0: i32) -> (i32, i32) {
    %c0_i32 = arith.constant 0 : i32
    %c0_i32_0 = arith.constant 0 : i32
    %c0_i32_1 = arith.constant 0 : i32
    return %c0_i32, %c0_i32_0 : i32, i32
  }
  func.func @transform_6(%arg0: i32) -> (i32, i32) {
    %c0_i32 = arith.constant 0 : i32
    %c0_i32_0 = arith.constant 0 : i32
    return %arg0, %c0_i32 : i32, i32
  }
}

</mosaic_0001>

<bundles_post_ra>
// kernel: vanilla_rnn_forward.1
= control target key start
LH: loop header
LB: loop body
LE: loop exit
PB: predicated region body
PF: predicated region fallthrough
CT: control target
= control target key end

     0   :  { %vm28_vm0 = vcmask 253952   ;;  %vm37_vm1 = vcmask 130048   ;;  %v418_v5 = vmov 0.0   ;;  %s518_s0 = inlined_call_operand.vmem [shape: f32[8,16], index: 0, kind: input, shape index: {}]   ;;  %s519_s1 = inlined_call_operand.vmem [shape: f32[16,32], index: 1, kind: input, shape index: {}]   ;;  %s520_s2 = inlined_call_operand.vmem [shape: f32[32,32], index: 2, kind: input, shape index: {}]   ;;  %s521_s3 = inlined_call_operand.vmem [shape: f32[1,32], index: 3, kind: input, shape index: {}]   ;;  %s522_s4 = inlined_call_operand.vmem [shape: f32[32,128], index: 4, kind: input, shape index: {}]   ;;  %s523_s5 = inlined_call_operand.vmem [shape: f32[1,128], index: 5, kind: input, shape index: {}]   ;;  %s524_s6 = inlined_call_operand.hbm [shape: f32[8,128], index: 6, kind: output, shape index: {}]  }
   0x1   :  { %v32_v0 = vld [vmem:[%s519_s1 + $0x8] sm:$0xff]  ;;  %v31_v1 = vld [vmem:[%s519_s1] sm:$0xff]  ;;  %v66_v3 = vld [vmem:[%s520_s2 + $0x18] sm:$0xff]  ;;  %29 = vst.msk [vmem:[#allocation3] sm:$0x1] %vm28_vm0, %v418_v5 }
   0x2   :  { %55 = vmatpush.msra.mxu0 %v32_v0  ;;  %v30_v2 = vld [vmem:[%s518_s0] sm:$0xff]  ;;  %v65_v4 = vld [vmem:[%s520_s2 + $0x10] sm:$0xff]  ;;  %84 = vmatpush.msra.mxu1 %v66_v3  ;;  %v64_v6 = vld [vmem:[%s520_s2 + $0x8] sm:$0xff] }
   0x3   :  { %109 = vmatpush.msra.mxu2 %v66_v3  ;;  %138 = vmatpush.msra.mxu3 %v66_v3 }
   0x4   :  { %56 = vmatpush.msra.mxu0 %v31_v1 }
   0x5   :  { %11 = vsyncpa [#allocation5], 0  ;;  %362 = vmatmul.msk.f32.vlgmr.msra.gmra.mxu0 %vm37_vm1, %v30_v2  ;;  %85 = vmatpush.msra.mxu1 %v65_v4  ;;  %v63_v7 = vld [vmem:[%s520_s2] sm:$0xff]  ;;  %vm61_vm2 = vcmask 261120   ;;  %vm296_vm3 = vcmask 1040384   ;;  %vm298_vm4 = vcmask 1041408  }
   0x6   :  { %110 = vmatpush.msra.mxu2 %v65_v4  ;;  %139 = vmatpush.msra.mxu3 %v65_v4  ;;  %v374_v9 = vld [vmem:[%s521_s3] ss:$0 sm:$0xff]  ;;  %vm300_vm5 = vcmask 1042432   ;;  %vm302_vm6 = vcmask 1043456   ;;  %vm304_vm7 = vcmask 1044480   ;;  %vm306_vm8 = vcmask 1045504  }
   0x7   :  { %86 = vmatpush.msra.mxu1 %v64_v6  ;;  %167 = vmatpush.msrb.mxu0 %v66_v3  ;;  %v317_v52 = vld [vmem:[%s522_s4 + $0x18] sm:$0xff]  ;;  %v316_v53 = vld [vmem:[%s522_s4 + $0x10] sm:$0xff]  ;;  %v315_v54 = vld [vmem:[%s522_s4 + $0x8] sm:$0xff]  ;;  %vm308_vm9 = vcmask 1046528   ;;  %vm311_vm10 = vcmask 261127   ;;  %s353_s22 = sshll.u32 %s524_s6, 4  ;;  %s354_s22 = int_to_ptr.hbm [resolvable:$true] %s353_s22 }
   0x8   :  { %111 = vmatpush.msra.mxu2 %v64_v6  ;;  %140 = vmatpush.msra.mxu3 %v64_v6  ;;  %v67_v8 = vld [vmem:[#allocation3] sm:$0x1]  ;;  %v314_v55 = vld [vmem:[%s522_s4] sm:$0xff]  ;;  %s419_s4 = smov [#allocation4]  }
   0x9   :  { %87 = vmatpush.msra.mxu1 %v63_v7  ;;  %168 = vmatpush.msrb.mxu0 %v65_v4  ;;  %v375_v62 = vld [vmem:[%s523_s5] ss:$0 sm:$0xff]  ;;  %s351_s19 = sshll.u32 %s419_s4, 4  ;;  %s352_s19 = int_to_ptr.vmem [resolvable:$true] %s351_s19 }
   0xa   :  { %363 = vmatmul.msk.f32.vlgmr.msra.gmra.mxu1 %vm61_vm2, %v67_v8  ;;  %112 = vmatpush.msra.mxu2 %v63_v7 }
   0xb   :  { %141 = vmatpush.msra.mxu3 %v63_v7  ;;  %169 = vmatpush.msrb.mxu0 %v64_v6 }
   0xc   :  { %196 = vmatpush.msrb.mxu1 %v66_v3  ;;  %225 = vmatpush.msrb.mxu2 %v66_v3 }
   0xd   :  { %170 = vmatpush.msrb.mxu0 %v63_v7  ;;  %254 = vmatpush.msrb.mxu3 %v66_v3 }
   0xe   :  { %197 = vmatpush.msrb.mxu1 %v65_v4  ;;  %226 = vmatpush.msrb.mxu2 %v65_v4 }
   0xf   :  { %255 = vmatpush.msrb.mxu3 %v65_v4  ;;  %283 = vmatpush.msra.mxu0 %v66_v3 }
  0x10   :  { %198 = vmatpush.msrb.mxu1 %v64_v6  ;;  %227 = vmatpush.msrb.mxu2 %v64_v6 }
  0x11   :  { %256 = vmatpush.msrb.mxu3 %v64_v6  ;;  %284 = vmatpush.msra.mxu0 %v65_v4 }
  0x12   :  { %199 = vmatpush.msrb.mxu1 %v63_v7  ;;  %228 = vmatpush.msrb.mxu2 %v63_v7 }
  0x13   :  { %257 = vmatpush.msrb.mxu3 %v63_v7  ;;  %285 = vmatpush.msra.mxu0 %v64_v6 }
  0x14   :  { %337 = vmatpush.msra.mxu1 %v317_v52 }
  0x15   :  { %286 = vmatpush.msra.mxu0 %v63_v7 }
  0x16   :  { %338 = vmatpush.msra.mxu1 %v316_v53 }
  0x18   :  { %339 = vmatpush.msra.mxu1 %v315_v54 }
  0x1a   :  { %340 = vmatpush.msra.mxu1 %v314_v55 }
  0x82   :  { %v58_v10 = vpop.f32.mrf.mxu0 }
  0x83   :  { %v59_v11 = vadd.f32 %v374_v9, %v58_v10 }
  0x85   :  { %62 = vst.msk [vmem:[#allocation2] sm:$0xff] %vm61_vm2, %v59_v11 }
  0x87   :  { %v89_v12 = vpop.f32.mrf.mxu1 }
  0x8c   :  { %v481_v13 = vld [vmem:[#allocation2] sm:$0xff] }
  0x8d   :  { %v92_v14 = vadd.f32 %v89_v12, %v481_v13 }
  0x8f   :  { %376 = vtanh.f32 %v92_v14 }
  0x95   :  { %v377_v15 = vpop.eup %376 }
  0x96   :  { %364 = vmatmul.msk.f32.vlgmr.msra.gmra.mxu2 %vm61_vm2, %v377_v15 }
 0x119   :  { %v114_v16 = vpop.f32.mrf.mxu2 }
 0x11a   :  { %v118_v17 = vrot.slane %v114_v16, 7 }
 0x11c   :  { %v120_v18 = vadd.f32 %v118_v17, %v481_v13 }
 0x11e   :  { %378 = vtanh.f32 %v120_v18 }
 0x124   :  { %v379_v19 = vpop.eup %378 }
 0x125   :  { %v123_v20 = vrot.slane %v379_v19, 1  ;;  %v297_v25 = vsel %vm296_vm3, %v377_v15, %v379_v19 }
 0x127   :  { %365 = vmatmul.msk.f32.vlgmr.msra.gmra.mxu3 %vm61_vm2, %v123_v20 }
 0x1aa   :  { %v143_v21 = vpop.f32.mrf.mxu3 }
 0x1ab   :  { %v147_v22 = vrot.slane %v143_v21, 6 }
 0x1ad   :  { %v149_v23 = vadd.f32 %v147_v22, %v481_v13 }
 0x1af   :  { %380 = vtanh.f32 %v149_v23 }
 0x1b5   :  { %v381_v24 = vpop.eup %380 }
 0x1b6   :  { %v299_v26 = vsel %vm298_vm4, %v297_v25, %v381_v24  ;;  %v152_v27 = vrot.slane %v381_v24, 2 }
 0x1b8   :  { %366 = vmatmul.msk.f32.vlgmr.msrb.gmra.mxu0 %vm61_vm2, %v152_v27 }
 0x235   :  { %v172_v28 = vpop.f32.mrf.mxu0 }
 0x236   :  { %v176_v29 = vrot.slane %v172_v28, 5 }
 0x238   :  { %v178_v30 = vadd.f32 %v176_v29, %v481_v13 }
 0x23a   :  { %382 = vtanh.f32 %v178_v30 }
 0x240   :  { %v383_v31 = vpop.eup %382 }
 0x241   :  { %v301_v32 = vsel %vm300_vm5, %v299_v26, %v383_v31  ;;  %v181_v33 = vrot.slane %v383_v31, 3 }
 0x243   :  { %367 = vmatmul.msk.f32.vlgmr.msrb.gmra.mxu1 %vm61_vm2, %v181_v33 }
 0x2c0   :  { %v201_v34 = vpop.f32.mrf.mxu1 }
 0x2c1   :  { %v205_v35 = vrot.slane %v201_v34, 4 }
 0x2c3   :  { %v207_v36 = vadd.f32 %v205_v35, %v481_v13 }
 0x2c5   :  { %384 = vtanh.f32 %v207_v36 }
 0x2cb   :  { %v385_v37 = vpop.eup %384 }
 0x2cc   :  { %v303_v38 = vsel %vm302_vm6, %v301_v32, %v385_v37  ;;  %v210_v39 = vrot.slane %v385_v37, 4 }
 0x2ce   :  { %368 = vmatmul.msk.f32.vlgmr.msrb.gmra.mxu2 %vm61_vm2, %v210_v39 }
 0x351   :  { %v230_v40 = vpop.f32.mrf.mxu2 }
 0x352   :  { %v234_v41 = vrot.slane %v230_v40, 3 }
 0x354   :  { %v236_v42 = vadd.f32 %v234_v41, %v481_v13 }
 0x356   :  { %386 = vtanh.f32 %v236_v42 }
 0x35c   :  { %v387_v43 = vpop.eup %386 }
 0x35d   :  { %v305_v44 = vsel %vm304_vm7, %v303_v38, %v387_v43  ;;  %v239_v45 = vrot.slane %v387_v43, 5 }
 0x35f   :  { %369 = vmatmul.msk.f32.vlgmr.msrb.gmra.mxu3 %vm61_vm2, %v239_v45 }
 0x3e2   :  { %v259_v46 = vpop.f32.mrf.mxu3 }
 0x3e3   :  { %v263_v47 = vrot.slane %v259_v46, 2 }
 0x3e5   :  { %v265_v48 = vadd.f32 %v263_v47, %v481_v13 }
 0x3e7   :  { %388 = vtanh.f32 %v265_v48 }
 0x3ed   :  { %v389_v49 = vpop.eup %388 }
 0x3ee   :  { %v268_v50 = vrot.slane %v389_v49, 6  ;;  %v307_v51 = vsel %vm306_vm8, %v305_v44, %v389_v49 }
 0x3f0   :  { %370 = vmatmul.msk.f32.vlgmr.msra.gmra.mxu0 %vm61_vm2, %v268_v50 }
 0x46d   :  { %v288_v56 = vpop.f32.mrf.mxu0 }
 0x46e   :  { %v292_v57 = vrot.slane %v288_v56, 1 }
 0x470   :  { %v294_v58 = vadd.f32 %v292_v57, %v481_v13 }
 0x472   :  { %390 = vtanh.f32 %v294_v58 }
 0x478   :  { %v391_v59 = vpop.eup %390 }
 0x479   :  { %v309_v60 = vsel %vm308_vm9, %v307_v51, %v391_v59  ;;  %312 = vst.msk [vmem:[#allocation3 - $0x7] sm:$0x80] %vm311_vm10, %v391_v59 }
 0x47a   :  { %310 = vst.msk [vmem:[#allocation2] sm:$0xff] %vm61_vm2, %v309_v60 }
 0x481   :  { %v313_v61 = vld [vmem:[#allocation2] sm:$0xff] }
 0x482   :  { %371 = vmatmul.msk.f32.vlgmr.msra.gmra.mxu1 %vm61_vm2, %v313_v61 }
 0x4ff   :  { %v342_v63 = vpop.f32.mrf.mxu1 }
 0x500   :  { %v343_v0 = vadd.f32 %v375_v62, %v342_v63 }
 0x502   :  { %345 = vst [vmem:[#allocation4] sm:$0xff] %v343_v0 }
 0x503   :  { %356 = dma.vmem_to_hbm [thread:$0]  %s352_s19, 128, %s354_s22, [#allocation5]  }
 0x504   :  { %416 = dma.done.wait [#allocation5], 128  }
 0x505   :  { %417 = vsyncadd [#allocation5], 4294967168 }
 0x506   :  { %361 = vsyncpa [#allocation5], 1 }

</bundles_post_ra>
